<compile_context>
chip_gen: v6e
topology: v6e:2x2x1
jax: 0.10.0
libtpu: 0.0.40
codegen_flags: <defaults>
</compile_context>

<pallas_src>
import functools

import jax
import jax.numpy as jnp
from jax import lax
from jax.experimental import pallas as pl
from jax.experimental.pallas import tpu as pltpu


def _round_up(x, m):
    return ((x + m - 1) // m) * m


def dgi_kernel(n_real, n_pad, h_pad,
               alpha_g_ref, alpha_d_ref,
               x_ref, a_ref, wg_ref, bg_ref, wd_ref,
               out_ref, z2_ref, v2_ref):
    """One grid step == one batch element.

    x_ref  : (2*N_pad, F_pad) bf16  -- [X_pos ; X_corr] stacked along rows
    a_ref  : (N_pad, N_pad)   bf16  -- zero-padded A_hat
    wg_ref : (F_pad, H_pad)   bf16
    bg_ref : (1, H_pad)       f32
    wd_ref : (H_pad, H_pad)   bf16  -- Bilinear weight (out_features == 1)
    alpha_*: (1,) f32 in SMEM       -- PReLU slopes
    out_ref: (2, N_pad)       f32   -- row 0 = D_pos, row 1 = D_corr
    z2_ref : (N_pad, 2*H_pad) bf16 VMEM scratch  -- [z_pos | z_corr]
    v2_ref : (2, 2*H_pad)     bf16 VMEM scratch  -- block-diagonal discriminator LHS
    """
    f32 = jnp.float32
    bf16 = jnp.bfloat16
    alpha_g = alpha_g_ref[0]
    alpha_d = alpha_d_ref[0]

    # ---- fused GCN linear: one (2*N_pad, F) @ (F, H) bf16 matmul, f32 accumulate ----
    z = jnp.dot(x_ref[...], wg_ref[...], preferred_element_type=f32)
    z = z + bg_ref[...]                                        # (2*N_pad, H_pad) f32

    # Pack z_pos / z_corr side by side along the lane axis via two casted stores
    # into a bf16 scratch (cast fuses into the store; no concat relayout), then do
    # the graph propagation for both views in ONE (N,N)x(N,2H) MXU matmul.
    z2_ref[:, :h_pad] = z[:n_pad, :].astype(bf16)
    z2_ref[:, h_pad:] = z[n_pad:, :].astype(bf16)
    hh = jnp.dot(a_ref[...], z2_ref[...], preferred_element_type=f32)
    hh = jnp.where(hh > 0, hh, alpha_g * hh)                   # PReLU (VPU), f32

    # Summary vector. Padded node rows of h_pos are exactly zero (A_hat is
    # zero-padded), so sum / n_real == mean over real nodes.
    s = jax.nn.sigmoid(jnp.sum(hh[:, :h_pad], axis=0, keepdims=True) * (1.0 / n_real))

    # Bilinear discriminator (no bias): D[n] = h[n,:] @ Wd @ s^T
    # v = s @ Wd^T : dot_general contracting the H axes -> no materialized transpose.
    dn = (((1,), (1,)), ((), ()))
    v = lax.dot_general(s.astype(bf16), wd_ref[...], dn,
                        preferred_element_type=f32)            # (1, H_pad)

    # Fused discriminator: block-diagonal (2, 2*H_pad) LHS so hh streams through
    # the MXU once and the result lands directly in the (2, N_pad) output layout.
    v2_ref[...] = jnp.zeros_like(v2_ref)
    v2_ref[0:1, :h_pad] = v.astype(bf16)
    v2_ref[1:2, h_pad:] = v.astype(bf16)
    d = lax.dot_general(v2_ref[...], hh.astype(bf16), dn,
                        preferred_element_type=f32)            # (2, N_pad)

    # PReLU + one unmasked lane-dense store (N_pad is a multiple of 128).
    out_ref[...] = jnp.where(d > 0, d, alpha_d * d)


def _vmem_limit_bytes(n_pad, f_pad, h_pad):
    """Actual per-step VMEM footprint + headroom, capped under v7x's 64 MiB."""
    bf, f4 = 2, 4
    need = 0
    need += 2 * (2 * n_pad * f_pad) * bf      # X block (double-buffered)
    need += 2 * (n_pad * n_pad) * bf          # A_hat (grid-invariant, double-buffered)
    need += 2 * (f_pad * h_pad) * bf          # W_gcn
    need += 2 * (1 * h_pad) * f4              # b_gcn
    need += 2 * (h_pad * h_pad) * bf          # W_disc
    need += 2 * (2 * n_pad) * f4              # out block
    need += (n_pad * 2 * h_pad) * bf          # z2 scratch
    need += (8 * 2 * h_pad) * f4              # v2 scratch (sublane-padded)
    need += (2 * n_pad * h_pad) * f4          # z intermediate
    need += (n_pad * 2 * h_pad) * f4          # hh intermediate
    return int(min(max(2 * need, 16 << 20), 48 << 20))


@functools.lru_cache(maxsize=None)
def _build_dgi_call(B, n_real, n_pad, f_pad, h_pad):
    kernel = functools.partial(dgi_kernel, n_real, n_pad, h_pad)

    def const_spec(shape):
        # Grid-invariant operands: same block for every batch step.
        return pl.BlockSpec(shape, lambda b: (0,) * len(shape))

    grid_spec = pltpu.PrefetchScalarGridSpec(
        num_scalar_prefetch=0,
        grid=(B,),
        in_specs=[
            pl.BlockSpec(memory_space=pltpu.MemorySpace.SMEM),            # alpha_gcn
            pl.BlockSpec(memory_space=pltpu.MemorySpace.SMEM),            # alpha_disc
            pl.BlockSpec((None, 2 * n_pad, f_pad), lambda b: (b, 0, 0)),  # [X_pos;X_corr]
            const_spec((n_pad, n_pad)),                                   # A_hat
            const_spec((f_pad, h_pad)),                                   # W_gcn
            const_spec((1, h_pad)),                                       # b_gcn
            const_spec((h_pad, h_pad)),                                   # W_disc
        ],
        out_specs=pl.BlockSpec((None, 2, n_pad), lambda b: (b, 0, 0)),
        scratch_shapes=[
            pltpu.VMEM((n_pad, 2 * h_pad), jnp.bfloat16),   # z2 = [z_pos | z_corr]
            pltpu.VMEM((2, 2 * h_pad), jnp.bfloat16),       # block-diagonal disc LHS
        ],
    )

    flops = B * (2 * (2 * n_pad) * f_pad * h_pad           # X @ W_gcn
                 + 2 * n_pad * n_pad * (2 * h_pad)         # A_hat @ [z_pos|z_corr]
                 + 2 * h_pad * h_pad                       # s @ W_disc^T
                 + 2 * 2 * (2 * h_pad) * n_pad)            # fused discriminator
    bytes_accessed = (B * (2 * n_pad) * f_pad * 2          # X (bf16)
                      + n_pad * n_pad * 2                  # A_hat
                      + f_pad * h_pad * 2 + h_pad * 4      # W_gcn, b_gcn
                      + h_pad * h_pad * 2                  # W_disc
                      + B * 2 * n_pad * 4)                 # out
    cost = pl.CostEstimate(flops=flops, transcendentals=B * h_pad,
                           bytes_accessed=bytes_accessed)

    return pl.pallas_call(
        kernel,
        out_shape=jax.ShapeDtypeStruct((B, 2, n_pad), jnp.float32),
        grid_spec=grid_spec,
        compiler_params=pltpu.CompilerParams(
            dimension_semantics=("parallel",),
            vmem_limit_bytes=_vmem_limit_bytes(n_pad, f_pad, h_pad),
        ),
        cost_estimate=cost,
    )


@jax.jit
def deep_graph_informax(pos_feat, corr_feat, a_hat, w_gcn, b_gcn, w_disc,
                        alpha_gcn, alpha_disc):
    B, N, F = pos_feat.shape
    H = w_gcn.shape[1]

    n_pad = _round_up(N, 128)   # N is the output lane dim and A_hat's lane dim
    f_pad = _round_up(F, 128)
    h_pad = _round_up(H, 128)

    bf16, f32 = jnp.bfloat16, jnp.float32

    def pad2(x, r, c, dtype):
        return jnp.zeros((r, c), dtype).at[:x.shape[0], :x.shape[1]].set(x.astype(dtype))

    # NOTE: padded regions MUST stay exactly zero -- the in-kernel node mean divides
    # by the real N and the discriminator relies on zero-padded rows/cols of
    # A_hat / W_gcn / b_gcn / W_disc.
    # Build the stacked, padded input in place (no extra concat copy).
    x_both = jnp.zeros((B, 2 * n_pad, f_pad), bf16)
    x_both = x_both.at[:, :N, :F].set(pos_feat.astype(bf16))
    x_both = x_both.at[:, n_pad:n_pad + N, :F].set(corr_feat.astype(bf16))

    a_p = pad2(a_hat, n_pad, n_pad, bf16)
    wg_p = pad2(w_gcn, f_pad, h_pad, bf16)
    bg_p = pad2(b_gcn, 1, h_pad, f32)
    wd_p = pad2(w_disc, h_pad, h_pad, bf16)

    call = _build_dgi_call(B, N, n_pad, f_pad, h_pad)
    out = call(alpha_gcn.astype(f32), alpha_disc.astype(f32),
               x_both, a_p, wg_p, bg_p, wd_p)

    # (B, 2, n_pad) -> (B, 2, N) -> (B, 2N)  ==  torch.cat((D_pos, D_corr), dim=1)
    return out[:, :, :N].reshape(B, 2 * N)


def _reference(pos_feat, corr_feat, a_hat, w_gcn, b_gcn, w_disc,
               alpha_gcn, alpha_disc):
    """Pure-JAX reference mirroring the PyTorch forward and the kernel's bf16 casts.

    NOTE: all matmul inputs are bf16-rounded (f32 accumulation) exactly as in the
    kernel; error vs a pure-f32 PyTorch forward grows with graph size N.
    """
    f32 = jnp.float32
    q = lambda x: x.astype(jnp.bfloat16).astype(f32)   # bf16 rounding, f32 math

    def prelu(x, a):
        return jnp.where(x > 0, x, a * x)

    A, Wg, Wd = q(a_hat), q(w_gcn), q(w_disc)

    def gcn(x):                                              # x: (B, N, F)
        z = jnp.einsum('bnf,fh->bnh', q(x), Wg) + b_gcn
        z = q(z)                                             # kernel stores Z as bf16
        return prelu(jnp.einsum('nm,bmh->bnh', A, z), alpha_gcn[0])

    hp = gcn(pos_feat)                                       # (B, N, H)
    hc = gcn(corr_feat)
    s = jax.nn.sigmoid(jnp.mean(hp, axis=1, keepdims=True))  # (B, 1, H)
    v = q(jnp.einsum('bih,kh->bik', q(s), Wd))               # s @ Wd^T (bf16 MXU inputs)
    d_pos = prelu(jnp.einsum('bik,bnk->bn', v, q(hp)), alpha_disc[0])
    d_corr = prelu(jnp.einsum('bik,bnk->bn', v, q(hc)), alpha_disc[0])
    return jnp.concatenate([d_pos, d_corr], axis=1)


if __name__ == "__main__":
    batch_size = 2
    n_node = 8
    n_input = 16
    n_hidden = 32

    key = jax.random.PRNGKey(0)
    k1, k2, k3, k4, k5 = jax.random.split(key, 5)

    pos_feat = jax.random.normal(k1, (batch_size, n_node, n_input), jnp.float32)
    corr_feat = jax.random.normal(k2, (batch_size, n_node, n_input), jnp.float32)

    # symmetric, row-normalized-ish adjacency (dense, shared across batch)
    adj = (jax.random.uniform(k3, (n_node, n_node)) > 0.5).astype(jnp.float32)
    adj = jnp.maximum(adj, adj.T) + jnp.eye(n_node, dtype=jnp.float32)
    deg = jnp.sum(adj, axis=1, keepdims=True)
    a_hat = adj / deg

    # GCN linear weights (xavier-uniform-like deterministic init)
    lim_g = (6.0 / (n_input + n_hidden)) ** 0.5
    w_gcn = jax.random.uniform(k4, (n_input, n_hidden), jnp.float32,
                               minval=-lim_g, maxval=lim_g)
    b_gcn = jnp.zeros((1, n_hidden), jnp.float32)

    # Bilinear discriminator weight (out_features=1, no bias), xavier-uniform-like
    lim_d = (6.0 / (n_hidden + n_hidden)) ** 0.5
    w_disc = jax.random.uniform(k5, (n_hidden, n_hidden), jnp.float32,
                                minval=-lim_d, maxval=lim_d)

    # PReLU slopes (torch default init = 0.25)
    alpha_gcn = jnp.array([0.25], jnp.float32)
    alpha_disc = jnp.array([0.25], jnp.float32)

    out = deep_graph_informax(pos_feat, corr_feat, a_hat, w_gcn, b_gcn,
                              w_disc, alpha_gcn, alpha_disc)
    out = jax.block_until_ready(out)

    ref = _reference(pos_feat, corr_feat, a_hat, w_gcn, b_gcn,
                     w_disc, alpha_gcn, alpha_disc)
    assert out.shape == (batch_size, 2 * n_node)
    err = float(jnp.max(jnp.abs(out - ref)))
    assert jnp.allclose(out, ref, atol=2e-3, rtol=2e-3), err

    print("KERNEL_OK")
</pallas_src>

<mosaic_0001>
module attributes {stable_mosaic.version = 11 : i64} {
  func.func @dgi_kernel(%arg0: i32, %arg1: memref<1xf32, #tpu.memory_space<smem>>, %arg2: memref<1xf32, #tpu.memory_space<smem>>, %arg3: memref<1x256x128xbf16, #tpu.memory_space<vmem>>, %arg4: memref<128x128xbf16, #tpu.memory_space<vmem>>, %arg5: memref<128x128xbf16, #tpu.memory_space<vmem>>, %arg6: memref<1x128xf32, #tpu.memory_space<vmem>>, %arg7: memref<128x128xbf16, #tpu.memory_space<vmem>>, %arg8: memref<1x2x128xf32, #tpu.memory_space<vmem>>, %arg9: memref<128x256xbf16, #tpu.memory_space<vmem>>, %arg10: memref<2x256xbf16, #tpu.memory_space<vmem>>) attributes {dimension_semantics = [#tpu.dimension_semantics<parallel>], iteration_bounds = array<i64: 2>, scalar_prefetch = 0 : i64, scratch_operands = 2 : i64, tpu.core_type = #tpu.core_type<tc>, window_params = [{transform_indices = @transform_0, window_bounds = array<i64: 1>}, {transform_indices = @transform_1, window_bounds = array<i64: 1>}, {transform_indices = @transform_2, window_bounds = array<i64: 1, 256, 128>}, {pipeline_mode = #tpu.pipeline_mode<synchronous>, transform_indices = @transform_3, window_bounds = array<i64: 128, 128>}, {pipeline_mode = #tpu.pipeline_mode<synchronous>, transform_indices = @transform_4, window_bounds = array<i64: 128, 128>}, {pipeline_mode = #tpu.pipeline_mode<synchronous>, transform_indices = @transform_5, window_bounds = array<i64: 1, 128>}, {pipeline_mode = #tpu.pipeline_mode<synchronous>, transform_indices = @transform_6, window_bounds = array<i64: 128, 128>}, {transform_indices = @transform_7, window_bounds = array<i64: 1, 2, 128>}]} {
    %c0 = arith.constant 0 : index
    %0 = memref.load %arg1[%c0] : memref<1xf32, #tpu.memory_space<smem>>
    %c0_0 = arith.constant 0 : index
    %1 = memref.load %arg2[%c0_0] : memref<1xf32, #tpu.memory_space<smem>>
    %c0_1 = arith.constant 0 : index
    %c0_2 = arith.constant 0 : index
    %c0_3 = arith.constant 0 : index
    %2 = vector.load %arg3[%c0_1, %c0_2, %c0_3] : memref<1x256x128xbf16, #tpu.memory_space<vmem>>, vector<1x256x128xbf16>
    %3 = vector.shape_cast %2 : vector<1x256x128xbf16> to vector<256x128xbf16>
    %c0_4 = arith.constant 0 : index
    %c0_5 = arith.constant 0 : index
    %4 = vector.load %arg5[%c0_4, %c0_5] : memref<128x128xbf16, #tpu.memory_space<vmem>>, vector<128x128xbf16>
    %cst = arith.constant dense<0.000000e+00> : vector<256x128xf32>
    %5 = tpu.matmul %3, %4, %cst {dimension_numbers = #tpu.dot_dimension_numbers<[1], [0], [0], [1], [0, 0, 1, 1], [], []>} : vector<256x128xbf16>, vector<128x128xbf16>, vector<256x128xf32> -> vector<256x128xf32>
    %c0_6 = arith.constant 0 : index
    %c0_7 = arith.constant 0 : index
    %6 = vector.load %arg6[%c0_6, %c0_7] : memref<1x128xf32, #tpu.memory_space<vmem>>, vector<1x128xf32>
    %7 = vector.broadcast %6 : vector<1x128xf32> to vector<256x128xf32>
    %8 = arith.addf %5, %7 : vector<256x128xf32>
    %9 = vector.extract_strided_slice %8 {offsets = [0, 0], sizes = [128, 128], strides = [1, 1]} : vector<256x128xf32> to vector<128x128xf32>
    %10 = arith.truncf %9 : vector<128x128xf32> to vector<128x128xbf16>
    %c0_8 = arith.constant 0 : index
    %c0_9 = arith.constant 0 : index
    %11 = vector.load %arg9[%c0_8, %c0_9] : memref<128x256xbf16, #tpu.memory_space<vmem>>, vector<128x128xbf16>
    tpu.vector_store %arg9[%c0_8, %c0_9], %10 {strides = array<i32>} : memref<128x256xbf16, #tpu.memory_space<vmem>>, vector<128x128xbf16>,
    %12 = vector.extract_strided_slice %8 {offsets = [128, 0], sizes = [128, 128], strides = [1, 1]} : vector<256x128xf32> to vector<128x128xf32>
    %13 = arith.truncf %12 : vector<128x128xf32> to vector<128x128xbf16>
    %c0_10 = arith.constant 0 : index
    %c128 = arith.constant 128 : index
    %14 = vector.load %arg9[%c0_10, %c128] : memref<128x256xbf16, #tpu.memory_space<vmem>>, vector<128x128xbf16>
    tpu.vector_store %arg9[%c0_10, %c128], %13 {strides = array<i32>} : memref<128x256xbf16, #tpu.memory_space<vmem>>, vector<128x128xbf16>,
    %c0_11 = arith.constant 0 : index
    %c0_12 = arith.constant 0 : index
    %15 = vector.load %arg4[%c0_11, %c0_12] : memref<128x128xbf16, #tpu.memory_space<vmem>>, vector<128x128xbf16>
    %c0_13 = arith.constant 0 : index
    %c0_14 = arith.constant 0 : index
    %16 = vector.load %arg9[%c0_13, %c0_14] : memref<128x256xbf16, #tpu.memory_space<vmem>>, vector<128x256xbf16>
    %cst_15 = arith.constant dense<0.000000e+00> : vector<128x256xf32>
    %17 = tpu.matmul %15, %16, %cst_15 {dimension_numbers = #tpu.dot_dimension_numbers<[1], [0], [0], [1], [0, 0, 1, 1], [], []>} : vector<128x128xbf16>, vector<128x256xbf16>, vector<128x256xf32> -> vector<128x256xf32>
    %cst_16 = arith.constant 0.000000e+00 : f32
    %18 = vector.broadcast %cst_16 : f32 to vector<128x256xf32>
    %19 = arith.cmpf ogt, %17, %18 : vector<128x256xf32>
    %20 = vector.broadcast %0 : f32 to vector<128x256xf32>
    %21 = arith.mulf %20, %17 : vector<128x256xf32>
    %22 = arith.select %19, %17, %21 : vector<128x256xi1>, vector<128x256xf32>
    %23 = vector.extract_strided_slice %22 {offsets = [0, 0], sizes = [128, 128], strides = [1, 1]} : vector<128x256xf32> to vector<128x128xf32>
    %cst_17 = arith.constant dense<0.000000e+00> : vector<128xf32>
    %24 = vector.multi_reduction <add>, %23, %cst_17 [0] : vector<128x128xf32> to vector<128xf32>
    %25 = vector.shape_cast %24 : vector<128xf32> to vector<1x128xf32>
    %cst_18 = arith.constant 1.250000e-01 : f32
    %26 = vector.broadcast %cst_18 : f32 to vector<1x128xf32>
    %27 = arith.mulf %25, %26 : vector<1x128xf32>
    %28 = arith.negf %27 : vector<1x128xf32>
    %29 = math.exp %28 : vector<1x128xf32>
    %cst_19 = arith.constant 1.000000e+00 : f32
    %30 = vector.broadcast %cst_19 : f32 to vector<1x128xf32>
    %31 = arith.addf %30, %29 : vector<1x128xf32>
    %32 = arith.divf %30, %31 : vector<1x128xf32>
    %33 = arith.truncf %32 : vector<1x128xf32> to vector<1x128xbf16>
    %c0_20 = arith.constant 0 : index
    %c0_21 = arith.constant 0 : index
    %34 = vector.load %arg7[%c0_20, %c0_21] : memref<128x128xbf16, #tpu.memory_space<vmem>>, vector<128x128xbf16>
    %cst_22 = arith.constant dense<0.000000e+00> : vector<1x128xf32>
    %35 = tpu.matmul %33, %34, %cst_22 {dimension_numbers = #tpu.dot_dimension_numbers<[1], [1], [0], [0], [0, 0, 1, 0], [], []>} : vector<1x128xbf16>, vector<128x128xbf16>, vector<1x128xf32> -> vector<1x128xf32>
    %cst_23 = arith.constant 0.000000e+00 : bf16
    %36 = vector.broadcast %cst_23 : bf16 to vector<2x256xbf16>
    %c0_24 = arith.constant 0 : index
    %c0_25 = arith.constant 0 : index
    %37 = vector.load %arg10[%c0_24, %c0_25] : memref<2x256xbf16, #tpu.memory_space<vmem>>, vector<2x256xbf16>
    tpu.vector_store %arg10[%c0_24, %c0_25], %36 {strides = array<i32>} : memref<2x256xbf16, #tpu.memory_space<vmem>>, vector<2x256xbf16>,
    %38 = arith.truncf %35 : vector<1x128xf32> to vector<1x128xbf16>
    %c0_26 = arith.constant 0 : index
    %c0_27 = arith.constant 0 : index
    %39 = vector.load %arg10[%c0_26, %c0_27] : memref<2x256xbf16, #tpu.memory_space<vmem>>, vector<1x128xbf16>
    tpu.vector_store %arg10[%c0_26, %c0_27], %38 {strides = array<i32>} : memref<2x256xbf16, #tpu.memory_space<vmem>>, vector<1x128xbf16>,
    %40 = arith.truncf %35 : vector<1x128xf32> to vector<1x128xbf16>
    %c1 = arith.constant 1 : index
    %c128_28 = arith.constant 128 : index
    %41 = vector.load %arg10[%c1, %c128_28] : memref<2x256xbf16, #tpu.memory_space<vmem>>, vector<1x128xbf16>
    tpu.vector_store %arg10[%c1, %c128_28], %40 {strides = array<i32>} : memref<2x256xbf16, #tpu.memory_space<vmem>>, vector<1x128xbf16>,
    %c0_29 = arith.constant 0 : index
    %c0_30 = arith.constant 0 : index
    %42 = vector.load %arg10[%c0_29, %c0_30] : memref<2x256xbf16, #tpu.memory_space<vmem>>, vector<2x256xbf16>
    %43 = arith.truncf %22 : vector<128x256xf32> to vector<128x256xbf16>
    %cst_31 = arith.constant dense<0.000000e+00> : vector<2x128xf32>
    %44 = tpu.matmul %42, %43, %cst_31 {dimension_numbers = #tpu.dot_dimension_numbers<[1], [1], [0], [0], [0, 0, 1, 0], [], []>} : vector<2x256xbf16>, vector<128x256xbf16>, vector<2x128xf32> -> vector<2x128xf32>
    %cst_32 = arith.constant 0.000000e+00 : f32
    %45 = vector.broadcast %cst_32 : f32 to vector<2x128xf32>
    %46 = arith.cmpf ogt, %44, %45 : vector<2x128xf32>
    %47 = vector.broadcast %1 : f32 to vector<2x128xf32>
    %48 = arith.mulf %47, %44 : vector<2x128xf32>
    %49 = arith.select %46, %44, %48 : vector<2x128xi1>, vector<2x128xf32>
    %c0_33 = arith.constant 0 : index
    %c0_34 = arith.constant 0 : index
    %c0_35 = arith.constant 0 : index
    %50 = vector.load %arg8[%c0_33, %c0_34, %c0_35] : memref<1x2x128xf32, #tpu.memory_space<vmem>>, vector<1x2x128xf32>
    %51 = vector.shape_cast %50 : vector<1x2x128xf32> to vector<2x128xf32>
    %52 = vector.shape_cast %49 : vector<2x128xf32> to vector<1x2x128xf32>
    tpu.vector_store %arg8[%c0_33, %c0_34, %c0_35], %52 {strides = array<i32>} : memref<1x2x128xf32, #tpu.memory_space<vmem>>, vector<1x2x128xf32>,
    return
  }
  func.func @transform_0(%arg0: i32) -> i32 {
    %c0_i32 = arith.constant 0 : i32
    %c0_i32_0 = arith.constant 0 : i32
    return %c0_i32 : i32
  }
  func.func @transform_1(%arg0: i32) -> i32 {
    %c0_i32 = arith.constant 0 : i32
    %c0_i32_0 = arith.constant 0 : i32
    return %c0_i32 : i32
  }
  func.func @transform_2(%arg0: i32) -> (i32, i32, i32) {
    %c0_i32 = arith.constant 0 : i32
    %c0_i32_0 = arith.constant 0 : i32
    %c0_i32_1 = arith.constant 0 : i32
    return %arg0, %c0_i32, %c0_i32_0 : i32, i32, i32
  }
  func.func @transform_3(%arg0: i32) -> (i32, i32) {
    %c0_i32 = arith.constant 0 : i32
    %c0_i32_0 = arith.constant 0 : i32
    %c0_i32_1 = arith.constant 0 : i32
    return %c0_i32, %c0_i32_0 : i32, i32
  }
  func.func @transform_4(%arg0: i32) -> (i32, i32) {
    %c0_i32 = arith.constant 0 : i32
    %c0_i32_0 = arith.constant 0 : i32
    %c0_i32_1 = arith.constant 0 : i32
    return %c0_i32, %c0_i32_0 : i32, i32
  }
  func.func @transform_5(%arg0: i32) -> (i32, i32) {
    %c0_i32 = arith.constant 0 : i32
    %c0_i32_0 = arith.constant 0 : i32
    %c0_i32_1 = arith.constant 0 : i32
    return %c0_i32, %c0_i32_0 : i32, i32
  }
  func.func @transform_6(%arg0: i32) -> (i32, i32) {
    %c0_i32 = arith.constant 0 : i32
    %c0_i32_0 = arith.constant 0 : i32
    %c0_i32_1 = arith.constant 0 : i32
    return %c0_i32, %c0_i32_0 : i32, i32
  }
  func.func @transform_7(%arg0: i32) -> (i32, i32, i32) {
    %c0_i32 = arith.constant 0 : i32
    %c0_i32_0 = arith.constant 0 : i32
    %c0_i32_1 = arith.constant 0 : i32
    return %arg0, %c0_i32, %c0_i32_0 : i32, i32, i32
  }
}

</mosaic_0001>

<bundles_post_ra>
// kernel: deep_graph_informax.1
= control target key start
LH: loop header
LB: loop body
LE: loop exit
PB: predicated region body
PF: predicated region fallthrough
CT: control target
= control target key end

     0   :  { %s1850_s28 = smov 0   ;;  %s2152_s0 = inlined_call_operand.<no memory space> [shape: f32[1], index: 0, kind: input, shape index: {}]   ;;  %s2153_s1 = inlined_call_operand.<no memory space> [shape: f32[1], index: 1, kind: input, shape index: {}]   ;;  %s2154_s2 = inlined_call_operand.vmem [shape: bf16[2,256,128], index: 2, kind: input, shape index: {}]   ;;  %s2155_s3 = inlined_call_operand.vmem [shape: bf16[128,128], index: 3, kind: input, shape index: {}]   ;;  %s2156_s4 = inlined_call_operand.vmem [shape: bf16[128,128], index: 4, kind: input, shape index: {}]   ;;  %s2157_s5 = inlined_call_operand.vmem [shape: f32[1,128], index: 5, kind: input, shape index: {}]   ;;  %s2158_s6 = inlined_call_operand.vmem [shape: bf16[128,128], index: 6, kind: input, shape index: {}]   ;;  %s2159_s7 = inlined_call_operand.vmem [shape: f32[2,2,128], index: 7, kind: output, shape index: {}]  }
   0x1   :  { %12 = sst [smem:[#allocation4]] %s2152_s0 }
   0x2   :  { %13 = sst [smem:[#allocation5]] %s2153_s1 }
   0x3 LB: > { %s1477_s29 = sadd.s32 4294967295, %s1798_s28   ;;  %p1481_p0 = scmp.ge.s32.totalorder %s1798_s28, 1  ;;  %s1798_s28 = sphi %s1850_s28, %s19_s28  }
   0x4   : > { %p239_p1 = scmp.lt.s32.totalorder %s1798_s28, 3 }
   0x6   : > { %p240_p2 = pnand %p1481_p0, %p239_p1 }
   0x7   : > { %p270_p3 = scmp.lt.s32.totalorder (!%p240_p2), %s1477_s29, 1  ;;  %s280_s13 = sld [smem:[#allocation4]] (!%p240_p2) }
   0x8   : > { %243 = sbr.rel (%p240_p2) target bundleno = 1063 (0x427), region = 48 }
   0xd   : > { %v1724_v0 = vld [vmem:[%s2156_s4 + $0x38] sm:$0xff]   ;;  %v1725_v1 = vld [vmem:[%s2156_s4 + $0x30] sm:$0xff]   ;;  %s2161_s29 = smov (!%p270_p3, %s1477_s29), 1  ;;  %v1726_v2 = vld [vmem:[%s2156_s4 + $0x28] sm:$0xff]   ;;  %v1800_v24 = vmov 0   ;;  %vm1802_vm0 = vmmov 0  }
   0xe   : > { %1644 = vmatprep.subr.bf16.mxu0 %v1724_v0  ;;  %s1578_s11 = sshll.u32 %s2161_s29, 7  ;;  %v1727_v3 = vld [vmem:[%s2156_s4 + $0x20] sm:$0xff]   ;;  %v1728_v5 = vld [vmem:[%s2156_s4 + $0x18] sm:$0xff]   ;;  %v1729_v6 = vld [vmem:[%s2156_s4 + $0x10] sm:$0xff]   ;;  %994 = vmatprep.mubr.bf16.mxu1 %v1800_v24  ;;  %1305 = vst [vmem:[#allocation3] sm:$0x3] %v1800_v24 }
   0xf   : > { %1645 = vmatpush3.bf16.msra.mxu0 %v1724_v0  ;;  %s1873_s14 = scalar_lea.vmem %s2154_s2, %s1578_s11  ;;  %v1730_v7 = vld [vmem:[%s2156_s4 + $0x8] sm:$0xff]   ;;  %v1731_v8 = vld [vmem:[%s2156_s4] sm:$0xff]   ;;  %s1484_s15 = sshll.u32 %s2161_s29, 1 }
  0x10   : > { %1646 = vmatprep.subr.bf16.mxu0 %v1725_v1  ;;  %v1732_v4 = vld [vmem:[%s1873_s14] sm:$0xff]   ;;  %v1733_v9 = vld [vmem:[%s1873_s14 + $0x8] sm:$0xff]   ;;  %v1734_v10 = vld [vmem:[%s1873_s14 + $0x10] sm:$0xff]   ;;  %s278_s18 = scalar_lea.vmem %s2159_s7, %s1484_s15 }
  0x11   : > { %1660 = vmatprep.mubr.bf16.mxu0 %v1732_v4  ;;  %v1735_v11 = vld [vmem:[%s1873_s14 + $0x18] sm:$0xff]   ;;  %v1736_v12 = vld [vmem:[%s1873_s14 + $0x20] sm:$0xff]   ;;  %v1737_v13 = vld [vmem:[%s1873_s14 + $0x28] sm:$0xff]  }
  0x12   : > { %v1738_v14 = vld [vmem:[%s1873_s14 + $0x30] sm:$0xff]   ;;  %v1739_v15 = vld [vmem:[%s1873_s14 + $0x38] sm:$0xff]   ;;  %v1740_v16 = vld [vmem:[%s1873_s14 + $0x40] sm:$0xff]  }
  0x13   : > { %1647 = vmatpush3.bf16.msra.mxu0 %v1725_v1  ;;  %v1741_v17 = vld [vmem:[%s1873_s14 + $0x48] sm:$0xff]   ;;  %v1742_v18 = vld [vmem:[%s1873_s14 + $0x50] sm:$0xff]   ;;  %v1743_v19 = vld [vmem:[%s1873_s14 + $0x58] sm:$0xff]  }
  0x14   : > { %1648 = vmatprep.subr.bf16.mxu0 %v1726_v2  ;;  %v1744_v20 = vld [vmem:[%s1873_s14 + $0x60] sm:$0xff]   ;;  %v1745_v21 = vld [vmem:[%s1873_s14 + $0x68] sm:$0xff]   ;;  %v1746_v22 = vld [vmem:[%s1873_s14 + $0x70] sm:$0xff]  }
  0x15   : > { %v1747_v23 = vld [vmem:[%s1873_s14 + $0x78] sm:$0xff]   ;;  %v1911_v25 = vld [vmem:[%s2157_s5] ss:$0 sm:$0xff]  ;;  %s281_s14 = sld [smem:[#allocation5]] }
  0x17   : > { %1649 = vmatpush3.bf16.msra.mxu0 %v1726_v2 }
  0x18   : > { %1650 = vmatprep.subr.bf16.mxu0 %v1727_v3 }
  0x1b   : > { %1651 = vmatpush3.bf16.msra.mxu0 %v1727_v3 }
  0x1c   : > { %1652 = vmatprep.subr.bf16.mxu0 %v1728_v5 }
  0x1f   : > { %1653 = vmatpush3.bf16.msra.mxu0 %v1728_v5 }
  0x20   : > { %1654 = vmatprep.subr.bf16.mxu0 %v1729_v6 }
  0x23   : > { %1655 = vmatpush3.bf16.msra.mxu0 %v1729_v6 }
  0x24   : > { %1656 = vmatprep.subr.bf16.mxu0 %v1730_v7 }
  0x27   : > { %1657 = vmatpush3.bf16.msra.mxu0 %v1730_v7 }
  0x28   : > { %1658 = vmatprep.subr.bf16.mxu0 %v1731_v8 }
  0x2b   : > { %1659 = vmatpush3.bf16.msra.mxu0 %v1731_v8 }
  0x2e   : > { %1661 = vmatmul.mubr.bf16.vlgmr.msra.gmra.mxu0 %v1733_v9 }
  0x2f   : > { %1664 = vmatprep.mubr.bf16.mxu0 %v1734_v10 }
  0x36   : > { %1665 = vmatmul.mubr.bf16.gmra.mxu0 %v1735_v11 }
  0x37   : > { %1668 = vmatprep.mubr.bf16.mxu0 %v1736_v12 }
  0x3e   : > { %1669 = vmatmul.mubr.bf16.gmra.mxu0 %v1737_v13 }
  0x3f   : > { %1672 = vmatprep.mubr.bf16.mxu0 %v1738_v14 }
  0x46   : > { %1673 = vmatmul.mubr.bf16.gmra.mxu0 %v1739_v15 }
  0x47   : > { %1676 = vmatprep.mubr.bf16.mxu0 %v1740_v16 }
  0x4e   : > { %1677 = vmatmul.mubr.bf16.gmra.mxu0 %v1741_v17 }
  0x4f   : > { %1680 = vmatprep.mubr.bf16.mxu0 %v1742_v18 }
  0x56   : > { %1681 = vmatmul.mubr.bf16.gmra.mxu0 %v1743_v19 }
  0x57   : > { %1684 = vmatprep.mubr.bf16.mxu0 %v1744_v20 }
  0x5e   : > { %1685 = vmatmul.mubr.bf16.gmra.mxu0 %v1745_v21 }
  0x5f   : > { %1688 = vmatprep.mubr.bf16.mxu0 %v1746_v22 }
  0x66   : > { %1689 = vmatmul.mubr.bf16.gmra.mxu0 %v1747_v23 }
  0xee   : > { %v1662_v26 = vpop.f32.mrf.mxu0 }
  0xef   : > { %v524_v27 = vadd.f32 %v1662_v26, %v1911_v25 }
  0xf0   : > { %v515_v28 = vpop.f32.mrf.mxu0 }
  0xf1   : > { %v1581_v29 = vpack.c.bf16 %v524_v27, %v524_v27  ;;  %v516_v30 = vadd.f32 %v1911_v25, %v515_v28 }
  0xf2   : > { %v1663_v31 = vpop.f32.mrf.mxu0 }
  0xf3   : > { %708 = vst [vmem:[#allocation2 + $0x10] sm:$0xf] %v1581_v29  ;;  %v1579_v32 = vpack.c.bf16 %v516_v30, %v516_v30  ;;  %v527_v33 = vadd.f32 %v1663_v31, %v1911_v25 }
  0xf4   : > { %v518_v34 = vpop.f32.mrf.mxu0 }
  0xf5   : > { %706 = vst [vmem:[#allocation2] sm:$0xf] %v1579_v32  ;;  %v1582_v35 = vpack.c.bf16 %v527_v33, %v527_v33  ;;  %v519_v36 = vadd.f32 %v1911_v25, %v518_v34 }
  0xf6   : > { %v1666_v37 = vpop.f32.mrf.mxu0 }
  0xf7   : > { %709 = vst [vmem:[#allocation2 + $0x18] sm:$0xf] %v1582_v35  ;;  %v1580_v38 = vpack.c.bf16 %v519_v36, %v519_v36  ;;  %v540_v39 = vadd.f32 %v1666_v37, %v1911_v25 }
  0xf8   : > { %v531_v40 = vpop.f32.mrf.mxu0 }
  0xf9   : > { %707 = vst [vmem:[#allocation2 + $0x8] sm:$0xf] %v1580_v38  ;;  %v1585_v41 = vpack.c.bf16 %v540_v39, %v540_v39  ;;  %v532_v42 = vadd.f32 %v1911_v25, %v531_v40 }
  0xfa   : > { %v1667_v43 = vpop.f32.mrf.mxu0 }
  0xfb   : > { %712 = vst [vmem:[#allocation2 + $0x30] sm:$0xf] %v1585_v41  ;;  %v1583_v44 = vpack.c.bf16 %v532_v42, %v532_v42  ;;  %v543_v45 = vadd.f32 %v1667_v43, %v1911_v25 }
  0xfc   : > { %v534_v46 = vpop.f32.mrf.mxu0 }
  0xfd   : > { %710 = vst [vmem:[#allocation2 + $0x20] sm:$0xf] %v1583_v44  ;;  %v1586_v47 = vpack.c.bf16 %v543_v45, %v543_v45  ;;  %v535_v48 = vadd.f32 %v1911_v25, %v534_v46 }
  0xfe   : > { %v1670_v49 = vpop.f32.mrf.mxu0 }
  0xff   : > { %713 = vst [vmem:[#allocation2 + $0x38] sm:$0xf] %v1586_v47  ;;  %v1584_v50 = vpack.c.bf16 %v535_v48, %v535_v48  ;;  %v556_v51 = vadd.f32 %v1670_v49, %v1911_v25 }
 0x100   : > { %v547_v52 = vpop.f32.mrf.mxu0 }
 0x101   : > { %711 = vst [vmem:[#allocation2 + $0x28] sm:$0xf] %v1584_v50  ;;  %v1589_v53 = vpack.c.bf16 %v556_v51, %v556_v51  ;;  %v548_v54 = vadd.f32 %v1911_v25, %v547_v52 }
 0x102   : > { %v1671_v55 = vpop.f32.mrf.mxu0 }
 0x103   : > { %716 = vst [vmem:[#allocation2 + $0x50] sm:$0xf] %v1589_v53  ;;  %v1587_v56 = vpack.c.bf16 %v548_v54, %v548_v54  ;;  %v559_v57 = vadd.f32 %v1671_v55, %v1911_v25 }
 0x104   : > { %v550_v58 = vpop.f32.mrf.mxu0 }
 0x105   : > { %714 = vst [vmem:[#allocation2 + $0x40] sm:$0xf] %v1587_v56  ;;  %v1590_v59 = vpack.c.bf16 %v559_v57, %v559_v57  ;;  %v551_v60 = vadd.f32 %v1911_v25, %v550_v58 }
 0x106   : > { %v1674_v61 = vpop.f32.mrf.mxu0 }
 0x107   : > { %717 = vst [vmem:[#allocation2 + $0x58] sm:$0xf] %v1590_v59  ;;  %v1588_v62 = vpack.c.bf16 %v551_v60, %v551_v60  ;;  %v572_v63 = vadd.f32 %v1674_v61, %v1911_v25 }
 0x108   : > { %v563_v0 = vpop.f32.mrf.mxu0 }
 0x109   : > { %715 = vst [vmem:[#allocation2 + $0x48] sm:$0xf] %v1588_v62  ;;  %v1593_v1 = vpack.c.bf16 %v572_v63, %v572_v63  ;;  %v564_v2 = vadd.f32 %v1911_v25, %v563_v0 }
 0x10a   : > { %v1675_v3 = vpop.f32.mrf.mxu0 }
 0x10b   : > { %720 = vst [vmem:[#allocation2 + $0x70] sm:$0xf] %v1593_v1  ;;  %v1591_v4 = vpack.c.bf16 %v564_v2, %v564_v2  ;;  %v575_v5 = vadd.f32 %v1675_v3, %v1911_v25 }
 0x10c   : > { %v566_v6 = vpop.f32.mrf.mxu0 }
 0x10d   : > { %718 = vst [vmem:[#allocation2 + $0x60] sm:$0xf] %v1591_v4  ;;  %v1594_v7 = vpack.c.bf16 %v575_v5, %v575_v5  ;;  %v567_v8 = vadd.f32 %v1911_v25, %v566_v6  ;;  %v1765_v6 = vld [vmem:[#allocation2 + $0x20] ss:$8 sps:$4 sm:$0xff]  }
 0x10e   : > { %v1678_v9 = vpop.f32.mrf.mxu0  ;;  %v1756_v1 = vld [vmem:[#allocation2 + $0x50] ss:$8 sps:$4 sm:$0xff]  }
 0x10f   : > { %721 = vst [vmem:[#allocation2 + $0x78] sm:$0xf] %v1594_v7  ;;  %v1592_v10 = vpack.c.bf16 %v567_v8, %v567_v8  ;;  %v588_v11 = vadd.f32 %v1678_v9, %v1911_v25  ;;  %v1768_v8 = vld [vmem:[#allocation2 + $0x10] ss:$8 sps:$4 sm:$0xff]  }
 0x110   : > { %v579_v12 = vpop.f32.mrf.mxu0  ;;  %v1759_v3 = vld [vmem:[#allocation2 + $0x40] ss:$8 sps:$4 sm:$0xff]  }
 0x111   : > { %719 = vst [vmem:[#allocation2 + $0x68] sm:$0xf] %v1592_v10  ;;  %v1597_v13 = vpack.c.bf16 %v588_v11, %v588_v11  ;;  %v580_v14 = vadd.f32 %v1911_v25, %v579_v12  ;;  %v1771_v10 = vld [vmem:[#allocation2] ss:$8 sps:$4 sm:$0xff]  }
 0x112   : > { %v1679_v15 = vpop.f32.mrf.mxu0  ;;  %v1772_v11 = vld [vmem:[%s2155_s3] sm:$0xff]   ;;  %v1773_v12 = vld [vmem:[%s2155_s3 + $0x8] sm:$0xff]  }
 0x113   : > { %788 = vst [vmem:[#allocation2 + $0x14] sm:$0xf] %v1597_v13  ;;  %v1595_v16 = vpack.c.bf16 %v580_v14, %v580_v14  ;;  %v591_v17 = vadd.f32 %v1679_v15, %v1911_v25  ;;  %v1774_v13 = vld [vmem:[%s2155_s3 + $0x10] sm:$0xff]   ;;  %v1775_v14 = vld [vmem:[%s2155_s3 + $0x18] sm:$0xff]   ;;  %v1776_v15 = vld [vmem:[%s2155_s3 + $0x20] sm:$0xff]  }
 0x114   : > { %v582_v18 = vpop.f32.mrf.mxu0 }
 0x115   : > { %786 = vst [vmem:[#allocation2 + $0x4] sm:$0xf] %v1595_v16  ;;  %v1598_v19 = vpack.c.bf16 %v591_v17, %v591_v17  ;;  %v583_v20 = vadd.f32 %v1911_v25, %v582_v18  ;;  %v1777_v16 = vld [vmem:[%s2155_s3 + $0x28] sm:$0xff]   ;;  %v1778_v17 = vld [vmem:[%s2155_s3 + $0x30] sm:$0xff]   ;;  %v1779_v18 = vld [vmem:[%s2155_s3 + $0x38] sm:$0xff]  }
 0x116   : > { %v1682_v21 = vpop.f32.mrf.mxu0  ;;  %v1750_v61 = vld [vmem:[#allocation2 + $0x70] ss:$8 sps:$4 sm:$0xff]  }
 0x117   : > { %789 = vst [vmem:[#allocation2 + $0x1c] sm:$0xf] %v1598_v19  ;;  %v1596_v22 = vpack.c.bf16 %v583_v20, %v583_v20  ;;  %v604_v23 = vadd.f32 %v1682_v21, %v1911_v25  ;;  %v1780_v19 = vld [vmem:[%s2158_s6 + $0x38] sm:$0xff]   ;;  %v1801_v20 = vmov 0.0   ;;  %v1781_v21 = vld [vmem:[%s2158_s6 + $0x30] sm:$0xff]  }
 0x118   : > { %v595_v26 = vpop.f32.mrf.mxu0  ;;  %v1753_v63 = vld [vmem:[#allocation2 + $0x60] ss:$8 sps:$4 sm:$0xff]   ;;  %1692 = vmatprep.subr.bf16.mxu0 %v1801_v20  ;;  %1708 = vmatprep.mubr.msk.bf16.mxu0 %vm1802_vm0, %v1801_v20 }
 0x119   : > { %787 = vst [vmem:[#allocation2 + $0xc] sm:$0xf] %v1596_v22  ;;  %v1601_v27 = vpack.c.bf16 %v604_v23, %v604_v23  ;;  %v596_v28 = vadd.f32 %v1911_v25, %v595_v26  ;;  %1693 = vmatpush3.bf16.xpose.msra.mxu0 %v1780_v19  ;;  %v1783_v22 = vld [vmem:[%s2158_s6 + $0x20] sm:$0xff]   ;;  %v1784_v23 = vld [vmem:[%s2158_s6 + $0x18] sm:$0xff]   ;;  %v1785_v26 = vld [vmem:[%s2158_s6 + $0x10] sm:$0xff]  }
 0x11a   : > { %v1683_v29 = vpop.f32.mrf.mxu0  ;;  %1694 = vmatprep.subr.bf16.mxu0 %v1801_v20 }
 0x11b   : > { %792 = vst [vmem:[#allocation2 + $0x34] sm:$0xf] %v1601_v27  ;;  %v1599_v30 = vpack.c.bf16 %v596_v28, %v596_v28  ;;  %v607_v31 = vadd.f32 %v1683_v29, %v1911_v25  ;;  %v1786_v27 = vld [vmem:[%s2158_s6 + $0x8] sm:$0xff]   ;;  %v1787_v28 = vld [vmem:[%s2158_s6] sm:$0xff]  }
 0x11c   : > { %v598_v32 = vpop.f32.mrf.mxu0 }
 0x11d   : > { %790 = vst [vmem:[#allocation2 + $0x24] sm:$0xf] %v1599_v30  ;;  %v1602_v33 = vpack.c.bf16 %v607_v31, %v607_v31  ;;  %v599_v34 = vadd.f32 %v1911_v25, %v598_v32  ;;  %v2000_v30 = vstv %s280_s13 }
 0x11e   : > { %v1686_v35 = vpop.f32.mrf.mxu0  ;;  %v1766_v7 = vld [vmem:[#allocation2 + $0x14] ss:$8 sps:$4 sm:$0xff]  }
 0x11f   : > { %793 = vst [vmem:[#allocation2 + $0x3c] sm:$0xf] %v1602_v33  ;;  %v1600_v36 = vpack.c.bf16 %v599_v34, %v599_v34  ;;  %v620_v37 = vadd.f32 %v1686_v35, %v1911_v25 }
 0x120   : > { %v611_v38 = vpop.f32.mrf.mxu0  ;;  %v1769_v9 = vld [vmem:[#allocation2 + $0x4] ss:$8 sps:$4 sm:$0xff]  }
 0x121   : > { %791 = vst [vmem:[#allocation2 + $0x2c] sm:$0xf] %v1600_v36  ;;  %v1605_v39 = vpack.c.bf16 %v620_v37, %v620_v37  ;;  %v612_v40 = vadd.f32 %v1911_v25, %v611_v38  ;;  %1695 = vmatpush3.bf16.xpose.msra.mxu0 %v1781_v21 }
 0x122   : > { %v1687_v41 = vpop.f32.mrf.mxu0  ;;  %1696 = vmatprep.subr.bf16.mxu0 %v1801_v20 }
 0x123   : > { %796 = vst [vmem:[#allocation2 + $0x54] sm:$0xf] %v1605_v39  ;;  %v1603_v42 = vpack.c.bf16 %v612_v40, %v612_v40  ;;  %v623_v43 = vadd.f32 %v1687_v41, %v1911_v25 }
 0x124   : > { %v614_v44 = vpop.f32.mrf.mxu0 }
 0x125   : > { %794 = vst [vmem:[#allocation2 + $0x44] sm:$0xf] %v1603_v42  ;;  %v1606_v45 = vpack.c.bf16 %v623_v43, %v623_v43  ;;  %v615_v46 = vadd.f32 %v1911_v25, %v614_v44 }
 0x126   : > { %v1690_v47 = vpop.f32.mrf.mxu0  ;;  %v1760_v4 = vld [vmem:[#allocation2 + $0x34] ss:$8 sps:$4 sm:$0xff]  }
 0x127   : > { %797 = vst [vmem:[#allocation2 + $0x5c] sm:$0xf] %v1606_v45  ;;  %v1604_v48 = vpack.c.bf16 %v615_v46, %v615_v46  ;;  %v636_v49 = vadd.f32 %v1690_v47, %v1911_v25 }
 0x128   : > { %v627_v50 = vpop.f32.mrf.mxu0  ;;  %v1763_v5 = vld [vmem:[#allocation2 + $0x24] ss:$8 sps:$4 sm:$0xff]  }
 0x129   : > { %795 = vst [vmem:[#allocation2 + $0x4c] sm:$0xf] %v1604_v48  ;;  %v1609_v51 = vpack.c.bf16 %v636_v49, %v636_v49  ;;  %v628_v52 = vadd.f32 %v1911_v25, %v627_v50 }
 0x12a   : > { %v1691_v53 = vpop.f32.mrf.mxu0 }
 0x12b   : > { %800 = vst [vmem:[#allocation2 + $0x74] sm:$0xf] %v1609_v51  ;;  %v1607_v54 = vpack.c.bf16 %v628_v52, %v628_v52  ;;  %v639_v55 = vadd.f32 %v1691_v53, %v1911_v25 }
 0x12c   : > { %v630_v56 = vpop.f32.mrf.mxu0 }
 0x12d   : > { %798 = vst [vmem:[#allocation2 + $0x64] sm:$0xf] %v1607_v54  ;;  %v1610_v57 = vpack.c.bf16 %v639_v55, %v639_v55  ;;  %v631_v58 = vadd.f32 %v1911_v25, %v630_v56  ;;  %v1762_v25 = vld [vmem:[#allocation2 + $0x30] ss:$8 sps:$4 sm:$0xff]  }
 0x12e   : > { %v1754_v0 = vld [vmem:[#allocation2 + $0x54] ss:$8 sps:$4 sm:$0xff]  }
 0x12f   : > { %801 = vst [vmem:[#allocation2 + $0x7c] sm:$0xf] %v1610_v57  ;;  %v1608_v59 = vpack.c.bf16 %v631_v58, %v631_v58 }
 0x130   : > { %v1757_v2 = vld [vmem:[#allocation2 + $0x44] ss:$8 sps:$4 sm:$0xff]  }
 0x131   : > { %799 = vst [vmem:[#allocation2 + $0x6c] sm:$0xf] %v1608_v59 }
 0x136   : > { %v1748_v60 = vld [vmem:[#allocation2 + $0x74] ss:$8 sps:$4 sm:$0xff]  }
 0x137   : > { %962 = vmatprep.subr.bf16.mxu1 %v1748_v60 }
 0x138   : > { %v1751_v62 = vld [vmem:[#allocation2 + $0x64] ss:$8 sps:$4 sm:$0xff]   ;;  %963 = vmatpush1.bf16.msra.mxu1 %v1750_v61 }
 0x139   : > { %964 = vmatprep.subr.bf16.mxu1 %v1751_v62 }
 0x13c   : > { %965 = vmatpush1.bf16.msra.mxu1 %v1753_v63 }
 0x13d   : > { %966 = vmatprep.subr.bf16.mxu1 %v1754_v0 }
 0x140   : > { %967 = vmatpush1.bf16.msra.mxu1 %v1756_v1 }
 0x141   : > { %968 = vmatprep.subr.bf16.mxu1 %v1757_v2 }
 0x144   : > { %969 = vmatpush1.bf16.msra.mxu1 %v1759_v3 }
 0x145   : > { %970 = vmatprep.subr.bf16.mxu1 %v1760_v4 }
 0x148   : > { %971 = vmatpush1.bf16.msra.mxu1 %v1762_v25 }
 0x149   : > { %972 = vmatprep.subr.bf16.mxu1 %v1763_v5 }
 0x14c   : > { %973 = vmatpush1.bf16.msra.mxu1 %v1765_v6 }
 0x14d   : > { %974 = vmatprep.subr.bf16.mxu1 %v1766_v7 }
 0x150   : > { %975 = vmatpush1.bf16.msra.mxu1 %v1768_v8 }
 0x151   : > { %976 = vmatprep.subr.bf16.mxu1 %v1769_v9 }
 0x154   : > { %977 = vmatpush1.bf16.msra.mxu1 %v1771_v10 }
 0x157   : > { %995 = vmatmul.mubr.bf16.vlgmr.msra.gmra.mxu1 %v1772_v11 }
 0x158   : > { %1004 = vmatprep.mubr.bf16.mxu1 %v1800_v24 }
 0x15f   : > { %1005 = vmatmul.mubr.bf16.gmra.mxu1 %v1773_v12 }
 0x160   : > { %1014 = vmatprep.mubr.bf16.mxu1 %v1800_v24 }
 0x167   : > { %1015 = vmatmul.mubr.bf16.gmra.mxu1 %v1774_v13 }
 0x168   : > { %1024 = vmatprep.mubr.bf16.mxu1 %v1800_v24 }
 0x16f   : > { %1025 = vmatmul.mubr.bf16.gmra.mxu1 %v1775_v14 }
 0x170   : > { %1034 = vmatprep.mubr.bf16.mxu1 %v1800_v24 }
 0x177   : > { %1035 = vmatmul.mubr.bf16.gmra.mxu1 %v1776_v15 }
 0x178   : > { %1044 = vmatprep.mubr.bf16.mxu1 %v1800_v24 }
 0x17f   : > { %1045 = vmatmul.mubr.bf16.gmra.mxu1 %v1777_v16 }
 0x180   : > { %1054 = vmatprep.mubr.bf16.mxu1 %v1800_v24 }
 0x187   : > { %1055 = vmatmul.mubr.bf16.gmra.mxu1 %v1778_v17 }
 0x188   : > { %1064 = vmatprep.mubr.bf16.mxu1 %v1800_v24  ;;  %v1782_v24 = vld [vmem:[%s2158_s6 + $0x28] sm:$0xff]  }
 0x189   : > { %1697 = vmatpush3.bf16.xpose.msra.mxu0 %v1782_v24 }
 0x18a   : > { %1698 = vmatprep.subr.bf16.mxu0 %v1801_v20 }
 0x18f   : > { %1065 = vmatmul.mubr.bf16.gmra.mxu1 %v1779_v18 }
 0x191   : > { %1699 = vmatpush3.bf16.xpose.msra.mxu0 %v1783_v22 }
 0x192   : > { %1700 = vmatprep.subr.bf16.mxu0 %v1801_v20 }
 0x199   : > { %1701 = vmatpush3.bf16.xpose.msra.mxu0 %v1784_v23 }
 0x19a   : > { %1702 = vmatprep.subr.bf16.mxu0 %v1801_v20 }
 0x1a1   : > { %1703 = vmatpush3.bf16.xpose.msra.mxu0 %v1785_v26 }
 0x1a2   : > { %1704 = vmatprep.subr.bf16.mxu0 %v1801_v20 }
 0x1a9   : > { %1705 = vmatpush3.bf16.xpose.msra.mxu0 %v1786_v27 }
 0x1aa   : > { %1706 = vmatprep.subr.bf16.mxu0 %v1801_v20 }
 0x1b1   : > { %1707 = vmatpush3.bf16.xpose.msra.mxu0 %v1787_v28 }
 0x217   : > { %v996_v29 = vpop.f32.mrf.mxu1 }
 0x218   : > { %v1108_v32 = vmul.f32 %v2000_v30, %v996_v29  ;;  %vm1075_vm2 = vcmp.gt.f32.partialorder %v996_v29, 0.0 }
 0x219   : > { %v998_v31 = vpop.f32.mrf.mxu1 }
 0x21a   : > { %vm1076_vm1 = vcmp.gt.f32.partialorder %v998_v31, 0.0  ;;  %v1109_v33 = vmul.f32 %v2000_v30, %v998_v31  ;;  %v2007_v38 = vsel %vm1075_vm2, %v996_v29, %v1108_v32 }
 0x21b   : > { %v1000_v34 = vpop.f32.mrf.mxu1 }
 0x21c   : > { %v2004_v35 = vsel %vm1076_vm1, %v998_v31, %v1109_v33  ;;  %vm1077_vm3 = vcmp.gt.f32.partialorder %v1000_v34, 0.0  ;;  %v1110_v36 = vmul.f32 %v2000_v30, %v1000_v34 }
 0x21d   : > { %v1002_v37 = vpop.f32.mrf.mxu1 }
 0x21e   : > { %v2009_v39 = vsel %vm1077_vm3, %v1000_v34, %v1110_v36  ;;  %vm1078_vm4 = vcmp.gt.f32.partialorder %v1002_v37, 0.0  ;;  %v1111_v40 = vmul.f32 %v2000_v30, %v1002_v37 }
 0x21f   : > { %v1338_v41 = vpack.c.bf16 %v2009_v39, %v2007_v38  ;;  %v1006_v42 = vpop.f32.mrf.mxu1  ;;  %v1172_v9 = vadd.f32 %v2009_v39, %v2007_v38 }
 0x220   : > { %v2014_v43 = vsel %vm1078_vm4, %v1002_v37, %v1111_v40  ;;  %v1112_v46 = vmul.f32 %v2000_v30, %v1006_v42  ;;  %vm1079_vm6 = vcmp.gt.f32.partialorder %v1006_v42, 0.0 }
 0x221   : > { %v1008_v44 = vpop.f32.mrf.mxu1  ;;  %v1339_v45 = vpack.c.bf16 %v2014_v43, %v2004_v35 }
 0x222   : > { %vm1080_vm5 = vcmp.gt.f32.partialorder %v1008_v44, 0.0  ;;  %v1113_v47 = vmul.f32 %v2000_v30, %v1008_v44  ;;  %v2023_v52 = vsel %vm1079_vm6, %v1006_v42, %v1112_v46 }
 0x223   : > { %v1010_v48 = vpop.f32.mrf.mxu1  ;;  %v1173_v12 = vadd.f32 %v1172_v9, %v2023_v52 }
 0x224   : > { %v2020_v49 = vsel %vm1080_vm5, %v1008_v44, %v1113_v47  ;;  %vm1081_vm7 = vcmp.gt.f32.partialorder %v1010_v48, 0.0  ;;  %v1114_v50 = vmul.f32 %v2000_v30, %v1010_v48 }
 0x225   : > { %v1012_v51 = vpop.f32.mrf.mxu1 }
 0x226   : > { %v2025_v53 = vsel %vm1081_vm7, %v1010_v48, %v1114_v50  ;;  %vm1082_vm8 = vcmp.gt.f32.partialorder %v1012_v51, 0.0  ;;  %v1115_v54 = vmul.f32 %v2000_v30, %v1012_v51 }
 0x227   : > { %v1340_v55 = vpack.c.bf16 %v2025_v53, %v2023_v52  ;;  %v1016_v56 = vpop.f32.mrf.mxu1  ;;  %v1174_v16 = vadd.f32 %v1173_v12, %v2025_v53  ;;  %v1310_v52 = vld [vmem:[#allocation3] sm:$0x1] }
 0x228   : > { %v2030_v57 = vsel %vm1082_vm8, %v1012_v51, %v1115_v54  ;;  %v1116_v8 = vmul.f32 %v2000_v30, %v1016_v56  ;;  %vm1083_vm11 = vcmp.gt.f32.partialorder %v1016_v56, 0.0 }
 0x229   : > { %v1018_v58 = vpop.f32.mrf.mxu1  ;;  %v1341_v59 = vpack.c.bf16 %v2030_v57, %v2020_v49 }
 0x22a   : > { %vm1084_vm9 = vcmp.gt.f32.partialorder %v1018_v58, 0.0  ;;  %v1117_v60 = vmul.f32 %v2000_v30, %v1018_v58  ;;  %v2055_v14 = vsel %vm1083_vm11, %v1016_v56, %v1116_v8 }
 0x22b   : > { %v1020_v61 = vpop.f32.mrf.mxu1  ;;  %v1175_v20 = vadd.f32 %v1174_v16, %v2055_v14 }
 0x22c   : > { %v2035_v62 = vsel %vm1084_vm9, %v1018_v58, %v1117_v60  ;;  %v1118_v11 = vmul.f32 %v2000_v30, %v1020_v61  ;;  %vm1085_vm12 = vcmp.gt.f32.partialorder %v1020_v61, 0.0 }
 0x22d   : > { %v1022_v63 = vpop.f32.mrf.mxu1 }
 0x22e   : > { %vm1086_vm10 = vcmp.gt.f32.partialorder %v1022_v63, 0.0  ;;  %v1119_v0 = vmul.f32 %v2000_v30, %v1022_v63  ;;  %v2059_v18 = vsel %vm1085_vm12, %v1020_v61, %v1118_v11 }
 0x22f   : > { %v1026_v1 = vpop.f32.mrf.mxu1  ;;  %v1176_v23 = vadd.f32 %v1175_v20, %v2059_v18 }
 0x230   : > { %v2038_v2 = vsel %vm1086_vm10, %v1022_v63, %v1119_v0  ;;  %v1120_v15 = vmul.f32 %v2000_v30, %v1026_v1  ;;  %vm1087_vm13 = vcmp.gt.f32.partialorder %v1026_v1, 0.0 }
 0x231   : > { %v2040_v3 = vpop.f32.mrf.mxu1  ;;  %v1343_v4 = vpack.c.bf16 %v2038_v2, %v2035_v62  ;;  %v1803_v62 = vmov 1966171168  }
 0x232   : > { %v2065_v24 = vsel %vm1087_vm13, %v1026_v1, %v1120_v15  ;;  %v1315_v2 = vunpack.c.l.s4 %v1803_v62 }
 0x233   : > { %v1030_v25 = vpop.f32.mrf.mxu1  ;;  %v1177_v29 = vadd.f32 %v1176_v23, %v2065_v24 }
 0x234   : > { %v1122_v19 = vmul.f32 %v2000_v30, %v1030_v25  ;;  %vm1089_vm14 = vcmp.gt.f32.partialorder %v1030_v25, 0.0  ;;  %v1316_v49 = vunpack.c.0.s8 %v1315_v2 }
 0x235   : > { %v2044_v5 = vpop.f32.mrf.mxu1 }
 0x236   : > { %v2069_v27 = vsel %vm1089_vm14, %v1030_v25, %v1122_v19 }
 0x237   : > { %v1036_v6 = vpop.f32.mrf.mxu1  ;;  %v1178_v34 = vadd.f32 %v1177_v29, %v2069_v27 }
 0x238   : > { %v1124_v22 = vmul.f32 %v2000_v30, %v1036_v6  ;;  %vm1091_vm15 = vcmp.gt.f32.partialorder %v1036_v6, 0.0 }
 0x239   : > { %v2046_v7 = vpop.f32.mrf.mxu1 }
 0x23a   : > { %v2075_v32 = vsel %vm1091_vm15, %v1036_v6, %v1124_v22  ;;  %vm1092_vm14 = vcmp.gt.f32.partialorder %v2046_v7, 0.0  ;;  %vm1090_vm15 = vcmp.gt.f32.partialorder %v2044_v5, 0.0 }
 0x23b   : > { %v1040_v10 = vpop.f32.mrf.mxu1  ;;  %v1179_v42 = vadd.f32 %v1178_v34, %v2075_v32 }
 0x23c   : > { %v1126_v28 = vmul.f32 %v2000_v30, %v1040_v10  ;;  %vm1093_vm0 = vcmp.gt.f32.partialorder %v1040_v10, 0.0 }
 0x23d   : > { %v2053_v13 = vpop.f32.mrf.mxu1 }
 0x23e   : > { %v2079_v37 = vsel %vm1093_vm0, %v1040_v10, %v1126_v28  ;;  %vm1094_vm13 = vcmp.gt.f32.partialorder %v2053_v13, 0.0  ;;  %vm1088_vm0 = vcmp.gt.f32.partialorder %v2040_v3, 0.0 }
 0x23f   : > { %v1046_v17 = vpop.f32.mrf.mxu1  ;;  %v1180_v48 = vadd.f32 %v1179_v42, %v2079_v37 }
 0x240   : > { %v1128_v33 = vmul.f32 %v2000_v30, %v1046_v17  ;;  %vm1095_vm1 = vcmp.gt.f32.partialorder %v1046_v17, 0.0 }
 0x241   : > { %v2063_v21 = vpop.f32.mrf.mxu1 }
 0x242   : > { %v2083_v46 = vsel %vm1095_vm1, %v1046_v17, %v1128_v33  ;;  %vm1096_vm12 = vcmp.gt.f32.partialorder %v2063_v21, 0.0  ;;  %vm1307_vm1 = vcmask 1040384  }
 0x243   : > { %v1050_v26 = vpop.f32.mrf.mxu1  ;;  %v1181_v56 = vadd.f32 %v1180_v48, %v2083_v46 }
 0x244   : > { %v1130_v40 = vmul.f32 %v2000_v30, %v1050_v26  ;;  %vm1097_vm2 = vcmp.gt.f32.partialorder %v1050_v26, 0.0 }
 0x245   : > { %v2073_v31 = vpop.f32.mrf.mxu1 }
 0x246   : > { %v2087_v51 = vsel %vm1097_vm2, %v1050_v26, %v1130_v40  ;;  %v1131_v48 = vmul.f32 %v2000_v30, %v2073_v31  ;;  %vm1098_vm11 = vcmp.gt.f32.partialorder %v2073_v31, 0.0  ;;  %vm1308_vm2 = vsmask.f32 256 }
 0x247   : > { %v1056_v36 = vpop.f32.mrf.mxu1  ;;  %v1182_v61 = vadd.f32 %v1181_v56, %v2087_v51 }
 0x248   : > { %v1132_v47 = vmul.f32 %v2000_v30, %v1056_v36  ;;  %vm1099_vm3 = vcmp.gt.f32.partialorder %v1056_v36, 0.0 }
 0x249   : > { %v1058_v44 = vpop.f32.mrf.mxu1 }
 0x24a   : > { %v1164_v60 = vsel %vm1099_vm3, %v1056_v36, %v1132_v47  ;;  %v1133_v19 = vmul.f32 %v2000_v30, %v1058_v44  ;;  %vm1100_vm10 = vcmp.gt.f32.partialorder %v1058_v44, 0.0  ;;  %vm1309_vm3 = vmand %vm1307_vm1, %vm1308_vm2 }
 0x24b   : > { %v1060_v50 = vpop.f32.mrf.mxu1  ;;  %v1183_v25 = vadd.f32 %v1182_v61, %v1164_v60 }
 0x24c   : > { %v1134_v54 = vmul.f32 %v2000_v30, %v1060_v50  ;;  %vm1101_vm4 = vcmp.gt.f32.partialorder %v1060_v50, 0.0  ;;  %v1165_v36 = vsel %vm1100_vm10, %v1058_v44, %v1133_v19  ;;  %v1163_v44 = vsel %vm1098_vm11, %v2073_v31, %v1131_v48 }
 0x24d   : > { %v1062_v58 = vpop.f32.mrf.mxu1 }
 0x24e   : > { %v1166_v0 = vsel %vm1101_vm4, %v1060_v50, %v1134_v54  ;;  %v1135_v11 = vmul.f32 %v2000_v30, %v1062_v58  ;;  %vm1102_vm7 = vcmp.gt.f32.partialorder %v1062_v58, 0.0  ;;  %v1129_v54 = vmul.f32 %v2000_v30, %v2063_v21 }
 0x24f   : > { %v1066_v63 = vpop.f32.mrf.mxu1  ;;  %v1184_v9 = vadd.f32 %v1183_v25, %v1166_v0  ;;  %vm1332_vm4 = vsmask.f32 7938 }
 0x250   : > { %vm1103_vm5 = vcmp.gt.f32.partialorder %v1066_v63, 0.0  ;;  %v1136_v1 = vmul.f32 %v2000_v30, %v1066_v63  ;;  %v1167_v26 = vsel %vm1102_vm7, %v1062_v58, %v1135_v11  ;;  %v1161_v61 = vsel %vm1096_vm12, %v2063_v21, %v1129_v54 }
 0x251   : > { %v1068_v6 = vpop.f32.mrf.mxu1  ;;  %v1351_v47 = vpack.c.bf16 %v1167_v26, %v1165_v36  ;;  %v1349_v25 = vpack.c.bf16 %v1163_v44, %v1161_v61  ;;  %v1123_v11 = vmul.f32 %v2000_v30, %v2044_v5 }
 0x252   : > { %v1168_v8 = vsel %vm1103_vm5, %v1066_v63, %v1136_v1  ;;  %v1137_v12 = vmul.f32 %v2000_v30, %v1068_v6  ;;  %vm1104_vm8 = vcmp.gt.f32.partialorder %v1068_v6, 0.0  ;;  %v1350_v63 = vpack.c.bf16 %v1166_v0, %v1164_v60  ;;  %vm1333_vm5 = vmand %vm1307_vm1, %vm1332_vm4 }
 0x253   : > { %v1070_v10 = vpop.f32.mrf.mxu1  ;;  %v1185_v16 = vadd.f32 %v1184_v9, %v1168_v8  ;;  %v1125_v9 = vmul.f32 %v2000_v30, %v2046_v7  ;;  %v1348_v60 = vpack.c.bf16 %v2087_v51, %v2083_v46  ;;  %v1346_v46 = vpack.c.bf16 %v2079_v37, %v2075_v32 }
 0x254   : > { %vm1105_vm6 = vcmp.gt.f32.partialorder %v1070_v10, 0.0  ;;  %v1138_v15 = vmul.f32 %v2000_v30, %v1070_v10  ;;  %v1169_v28 = vsel %vm1104_vm8, %v1068_v6, %v1137_v12  ;;  %v1127_v6 = vmul.f32 %v2000_v30, %v2053_v13 }
 0x255   : > { %v1072_v17 = vpop.f32.mrf.mxu1  ;;  %v1157_v21 = vsel %vm1092_vm14, %v2046_v7, %v1125_v9  ;;  %v1121_v12 = vmul.f32 %v2000_v30, %v2040_v3 }
 0x256   : > { %v1170_v20 = vsel %vm1105_vm6, %v1070_v10, %v1138_v15  ;;  %vm1106_vm9 = vcmp.gt.f32.partialorder %v1072_v17, 0.0  ;;  %v1139_v22 = vmul.f32 %v2000_v30, %v1072_v17  ;;  %v1159_v10 = vsel %vm1094_vm13, %v2053_v13, %v1127_v6 }
 0x257   : > { %v1186_v23 = vadd.f32 %v1185_v16, %v1170_v20  ;;  %v1352_v40 = vpack.c.bf16 %v1170_v20, %v1168_v8  ;;  %v1347_v0 = vpack.c.bf16 %v1159_v10, %v1157_v21  ;;  %v1155_v13 = vsel %vm1090_vm15, %v2044_v5, %v1123_v11 }
 0x258   : > { %v1171_v29 = vsel %vm1106_vm9, %v1072_v17, %v1139_v22  ;;  %v1153_v7 = vsel %vm1088_vm0, %v2040_v3, %v1121_v12  ;;  %v1344_v17 = vpack.c.bf16 %v2069_v27, %v2065_v24  ;;  %v1342_v30 = vpack.c.bf16 %v2059_v18, %v2055_v14 }
 0x259   : > { %v1187_v33 = vrot.slane %v1186_v23, 4  ;;  %v1353_v34 = vpack.c.bf16 %v1171_v29, %v1169_v28  ;;  %v1345_v51 = vpack.c.bf16 %v1155_v13, %v1153_v7  ;;  %v1420_v20 = vstv %s281_s14 }
 0x25b   : > { %v1188_v42 = vadd.f32 %v1187_v33, %v1186_v23  ;;  %1379 = vmatprep.subr.bf16.mxu1 %v1353_v34 }
 0x25c   : > { %1380 = vmatpush1.bf16.xpose.msra.mxu1 %v1352_v40 }
 0x25d   : > { %v1189_v50 = vrot.slane %v1188_v42, 2  ;;  %1381 = vmatprep.subr.bf16.mxu1 %v1351_v47 }
 0x25f   : > { %v1190_v56 = vadd.f32 %v1189_v50, %v1188_v42 }
 0x261   : > { %v1191_v58 = vrot.slane %v1190_v56, 1 }
 0x263   : > { %v1192_v1 = vadd.f32 %v1191_v58, %v1190_v56 }
 0x264   : > { %1382 = vmatpush1.bf16.xpose.msra.mxu1 %v1350_v63 }
 0x265   : > { %v1566_v8 = vmul.f32 -0.125, %v1192_v1  ;;  %1383 = vmatprep.subr.bf16.mxu1 %v1349_v25 }
 0x267   : > { %v1195_v31 = vmul.f32 1.442695, %v1566_v8 }
 0x269   : > { %1788 = vpow2.f32 %v1195_v31 }
 0x26c   : > { %1384 = vmatpush1.bf16.xpose.msra.mxu1 %v1348_v60 }
 0x26d   : > { %1385 = vmatprep.subr.bf16.mxu1 %v1347_v0 }
 0x274   : > { %1386 = vmatpush1.bf16.xpose.msra.mxu1 %v1346_v46 }
 0x275   : > { %1387 = vmatprep.subr.bf16.mxu1 %v1345_v51 }
 0x276   : > { %v1789_v15 = vpop.eup %1788 }
 0x277   : > { %v1197_v16 = vadd.f32 1.0, %v1789_v15 }
 0x279   : > { %1790 = vrcp.f32 %v1197_v16 }
 0x27c   : > { %1388 = vmatpush1.bf16.xpose.msra.mxu1 %v1344_v17 }
 0x27d   : > { %1389 = vmatprep.subr.bf16.mxu1 %v1343_v4  ;;  %v1317_v4 = vlaneseq }
 0x27f   : > { %v1318_v57 = vshrl.u32 %v1317_v4, 7 }
 0x284   : > { %1390 = vmatpush1.bf16.xpose.msra.mxu1 %v1342_v30 }
 0x285   : > { %1391 = vmatprep.subr.bf16.mxu1 %v1341_v59  ;;  %v1319_v59 = vsub.s32 %v1316_v49, %v1318_v57 }
 0x286   : > { %v1791_v3 = vpop.eup %1790 }
 0x287   : > { %v1200_v5 = vpack.c.bf16 %v1791_v3, %v1791_v3 }
 0x289   : > { %1709 = vmatmul.mubr.bf16.vlgmr.msra.gmra.mxu0 %v1200_v5 }
 0x28c   : > { %1392 = vmatpush1.bf16.xpose.msra.mxu1 %v1340_v55 }
 0x28d   : > { %1393 = vmatprep.subr.bf16.mxu1 %v1339_v45 }
 0x294   : > { %1394 = vmatpush1.bf16.xpose.msra.mxu1 %v1338_v41  ;;  %v1334_v41 = vld [vmem:[#allocation3 + $0x1] sm:$0x1] }
 0x349   : > { %v1299_v14 = vpop.f32.mrf.mxu0 }
 0x34a   : > { %v1306_v53 = vpack.c.bf16 %v1299_v14, %v1299_v14 }
 0x34b   : > { %v1710_v55 = vpop.f32.mrf.mxu0 }
 0x34c   : > { %v1311_v18 = vsel %vm1309_vm3, %v1306_v53, %v1310_v52  ;;  %v1320_v35 = vrot.slane %v1306_v53, %v1319_v59 }
 0x34d   : > { %1312 = vst [vmem:[#allocation3] sm:$0x1] %v1311_v18  ;;  %v1302_v38 = vpop.f32.mrf.mxu0 }
 0x34e   : > { %v1327_v39 = vrot.slane %v1320_v35, %v1319_v59 }
 0x34f   : > { %v1711_v43 = vpop.f32.mrf.mxu0 }
 0x350   : > { %v1329_v45 = vshll.u32 %v1327_v39, 16 }
 0x352   : > { %v1335_v24 = vsel %vm1333_vm5, %v1329_v45, %v1334_v41 }
 0x353   : > { %1336 = vst [vmem:[#allocation3 + $0x1] sm:$0x1] %v1335_v24 }
 0x35a   : > { %v1575_v27 = vld.sshfl [vmem:[#allocation3] sm:$0x11 pattern:$0x75316420] }
 0x35b   : > { %v1362_v32 = vcombine.high %v1575_v27, %v1575_v27  ;;  %v1369_v19 = vrot.slane %v1575_v27, %v1319_v59 }
 0x35d   : > { %v1376_v37 = vrot.slane %v1362_v32, %v1319_v59 }
 0x35f   : > { %1411 = vmatprep.mubr.bf16.mxu1 %v1376_v37 }
 0x360   : > { %1412 = vmatmul.mubr.bf16.vlgmr.msra.gmra.mxu1 %v1369_v19 }
 0x420   : > { %v1413_v22 = vpop.f32.mrf.mxu1 }
 0x421   : > { %vm1419_vm6 = vcmp.gt.f32.partialorder %v1413_v22, 0.0  ;;  %v1421_v23 = vmul.f32 %v1420_v20, %v1413_v22 }
 0x422   : > { %v1415_v26 = vpop.f32.mrf.mxu1 }
 0x423   : > { %v1422_v28 = vsel %vm1419_vm6, %v1413_v22, %v1421_v23 }
 0x424   : > { %1423 = vst [vmem:[%s278_s18] sm:$0x3] %v1422_v28  ;;  %v1416_v29 = vpop.f32.mrf.mxu1 }
 0x426   : > { %v1417_v33 = vpop.f32.mrf.mxu1 }
 0x427 PF: > { %s19_s28 = sadd.s32 1, %s1798_s28  }
 0x428   : > { %p16_p4 = scmp.ge.s32.totalorder %s19_s28, 4  }
 0x42a   :  { %18 = sbr.rel (!%p16_p4) target bundleno = 3 (0x3), region = 78 }

</bundles_post_ra>
